<compile_context>
chip_gen: v5e
topology: v5e:2x2
jax: 0.10.0
libtpu: 0.0.40
codegen_flags: <defaults>
</compile_context>

<pallas_src>
import functools

import jax
import jax.numpy as jnp
from jax.experimental import pallas as pl
from jax.experimental.pallas import tpu as pltpu

_H1 = 512            # fc1 width
_H2 = 128            # fc2 / residual width
_H2X2 = 2 * _H2      # fused [fc2 | residual] width
_NEG_SLOPE = 0.2
_TB_MAX = 256        # max batch tile (fills MXU M, multiple of 8 sublanes)
_TK = 1024           # fc1 K tile (input_length chunk)
_LANE = 128


def _leaky_relu(v):
    # max(v, 0.2*v) == LeakyReLU(0.2)(v): one VALU max instead of cmp+select.
    return jnp.maximum(v, _NEG_SLOPE * v)


def _round_up(n, m):
    return ((n + m - 1) // m) * m


def _k_tiling(din):
    """(tk, din_pad, nk) for the fc1 reduction (input_length) axis."""
    if din <= _TK:
        return din, din, 1
    din_pad = _round_up(din, _TK)
    return _TK, din_pad, din_pad // _TK


def fc_kernel(style_ref,                     # scalar prefetch (SMEM); consumed by index_maps
              x_ref, w1_ref, b1_ref,
              wf_ref, bf_ref,                # fused [w2 | res_w[style]] / [b2 | res_b[style]]
              w3s_ref, b3_ref,               # stacked [w3; w3] (256, Dout_pad) / bias
              o_ref,
              acc_ref):                      # (TB, 512) f32 fc1 accumulator (scratch)
    del style_ref
    k = pl.program_id(1)

    @pl.when(k == 0)
    def _():
        acc_ref[...] = jnp.zeros_like(acc_ref)

    # fc1 partial product: bf16 MXU, f32 accumulation in VMEM scratch.
    acc_ref[...] += jnp.dot(x_ref[...].astype(jnp.bfloat16), w1_ref[...],
                            preferred_element_type=jnp.float32)

    @pl.when(k == pl.num_programs(1) - 1)
    def _():
        mid = _leaky_relu(acc_ref[...] + b1_ref[...]).astype(jnp.bfloat16)
        # fused fc2 + residual[style]: one (512, 256) dot. Bias + LeakyReLU are
        # elementwise, so applying them on the fused 256-wide tile is per-branch exact.
        hf = _leaky_relu(
            jnp.dot(mid, wf_ref[...], preferred_element_type=jnp.float32)
            + bf_ref[...]).astype(jnp.bfloat16)
        # fc3 with the residual add folded in: (h2 ++ hr) @ [W3; W3] == (h2 + hr) @ W3.
        out = _leaky_relu(
            jnp.dot(hf, w3s_ref[...], preferred_element_type=jnp.float32) + b3_ref[...])
        o_ref[...] = out.astype(o_ref.dtype)


@functools.partial(jax.jit, static_argnames=("output_length",))
def fc_forward(x, style_num, kparams, output_length):
    """x: (B, input_length) f32, style_num: (1,) int32, kparams from prepare_kernel_params."""
    B, Din = x.shape
    w1, b1 = kparams["w1"], kparams["b1"]
    wf, bf = kparams["w_fused"], kparams["b_fused"]
    w3s, b3 = kparams["w3_stacked"], kparams["b3_pad"]
    Dout_pad = w3s.shape[1]

    # ---- fc1 K tiling over input_length ----
    tk, din_pad, nk = _k_tiling(Din)
    assert w1.shape[0] == din_pad, "kparams were prepared for a different input_length"

    # ---- batch tiling: >= 2 tiles once B >= 16 so v7x's two TCs both get work ----
    B8 = _round_up(max(B, 8), 8)
    TB = min(_TB_MAX, max(8, _round_up(B8 // 2, 8)))
    B_pad = _round_up(B8, TB)
    pad_r, pad_c = B_pad - B, din_pad - Din
    if pad_r or pad_c:
        x = jnp.pad(x, ((0, pad_r), (0, pad_c)))
    nb = B_pad // TB

    # ---- VMEM budget (bf16 weights; resident weights single-buffered; tk bounds x/w1) ----
    f32, bf16 = 4, 2
    w1_bufs = 1 if nk == 1 else 2
    vmem_est = (
        2 * TB * tk * f32                              # x blocks (double-buffered)
        + 2 * TB * Dout_pad * f32                      # out blocks (double-buffered)
        + w1_bufs * tk * _H1 * bf16                    # w1 chunk(s)
        + _H1 * f32                                    # b1 (resident)
        + _H1 * _H2X2 * bf16 + _H2X2 * f32             # fused w/b (resident)
        + _H2X2 * Dout_pad * bf16 + Dout_pad * f32     # stacked w3 / b3 (resident)
        + TB * _H1 * f32                               # fc1 accumulator scratch
        + TB * (_H1 * f32 + _H2X2 * bf16 + Dout_pad * f32)   # live activations
    )
    # Cap well below v7x's 64 MiB/TC so compiler internal scratch keeps headroom.
    vmem_limit = int(min(48 * 2**20,
                         max(16 * 2**20, vmem_est + vmem_est // 4 + (2 << 20))))

    cost = pl.CostEstimate(
        flops=2 * B_pad * (din_pad * _H1 + _H1 * _H2X2 + _H2X2 * Dout_pad),
        transcendentals=0,
        bytes_accessed=(f32 * (B_pad * din_pad + B_pad * Dout_pad
                               + _H1 + _H2X2 + Dout_pad)
                        + bf16 * (din_pad * _H1 + _H1 * _H2X2 + _H2X2 * Dout_pad)),
    )

    resident = pl.Buffered(1)   # block never changes across the grid: single-buffer it
    grid_spec = pltpu.PrefetchScalarGridSpec(
        num_scalar_prefetch=1,
        grid=(nb, nk),
        in_specs=[
            pl.BlockSpec((TB, tk), lambda i, k, s: (i, k)),                      # x
            pl.BlockSpec((tk, _H1), lambda i, k, s: (k, 0),
                         pipeline_mode=(resident if nk == 1 else None)),         # w1
            pl.BlockSpec((1, _H1), lambda i, k, s: (0, 0),
                         pipeline_mode=resident),                                # b1
            pl.BlockSpec((pl.Squeezed(), _H1, _H2X2), lambda i, k, s: (s[0], 0, 0),
                         pipeline_mode=resident),                                # [w2 | res_w[s]]
            pl.BlockSpec((pl.Squeezed(), 1, _H2X2), lambda i, k, s: (s[0], 0, 0),
                         pipeline_mode=resident),                                # [b2 | res_b[s]]
            pl.BlockSpec((_H2X2, Dout_pad), lambda i, k, s: (0, 0),
                         pipeline_mode=resident),                                # [w3; w3]
            pl.BlockSpec((1, Dout_pad), lambda i, k, s: (0, 0),
                         pipeline_mode=resident),                                # b3
        ],
        out_specs=pl.BlockSpec((TB, Dout_pad), lambda i, k, s: (i, 0)),
        scratch_shapes=[pltpu.VMEM((TB, _H1), jnp.float32)],
    )

    out = pl.pallas_call(
        fc_kernel,
        out_shape=jax.ShapeDtypeStruct((B_pad, Dout_pad), jnp.float32),
        grid_spec=grid_spec,
        compiler_params=pltpu.CompilerParams(
            dimension_semantics=("parallel", "arbitrary"),
            vmem_limit_bytes=vmem_limit),
        cost_estimate=cost,
    )(style_num, x, w1, b1, wf, bf, w3s, b3)

    return out[:B, :output_length]


def init_params(key, input_length, output_length, max_style_num):
    """Parameters in the same logical layout as the PyTorch module (transposed weights)."""
    ks = jax.random.split(key, 8)
    scale = 0.05
    return {
        "w1": scale * jax.random.normal(ks[0], (input_length, _H1), jnp.float32),
        "b1": scale * jax.random.normal(ks[1], (1, _H1), jnp.float32),
        "w2": scale * jax.random.normal(ks[2], (_H1, _H2), jnp.float32),
        "b2": scale * jax.random.normal(ks[3], (1, _H2), jnp.float32),
        "res_w": scale * jax.random.normal(ks[4], (max_style_num, _H1, _H2), jnp.float32),
        "res_b": scale * jax.random.normal(ks[5], (max_style_num, 1, _H2), jnp.float32),
        "w3": scale * jax.random.normal(ks[6], (_H2, output_length), jnp.float32),
        "b3": scale * jax.random.normal(ks[7], (1, output_length), jnp.float32),
    }


def prepare_kernel_params(params):
    """One-time prep: bf16 weights, fc2+residual fusion, stacked/lane-padded fc3, padded fc1 K."""
    n_styles = params["res_w"].shape[0]
    w2, b2 = params["w2"], params["b2"]
    # Fused [fc2 | residual[style]] weights/biases (per style).
    # NOTE: broadcasts w2 per style (n_styles x 512 x 128 bf16 extra HBM); fine for small
    # max_style_num — keep w2 separate and DMA only res_w[style] if styles are many.
    w_fused = jnp.concatenate(
        [jnp.broadcast_to(w2[None], (n_styles,) + w2.shape), params["res_w"]],
        axis=-1).astype(jnp.bfloat16)
    b_fused = jnp.concatenate(
        [jnp.broadcast_to(b2[None], (n_styles,) + b2.shape), params["res_b"]],
        axis=-1).astype(jnp.float32)

    # fc3: lane-pad Dout to a multiple of 128 and stack [w3; w3] so that
    # (h2 ++ hr) @ [w3; w3] == (h2 + hr) @ w3 (folds the residual add into the MXU).
    dout = params["w3"].shape[1]
    dout_pad = _round_up(max(dout, _LANE), _LANE)
    w3_pad = jnp.pad(params["w3"], ((0, 0), (0, dout_pad - dout)))
    w3_stacked = jnp.concatenate([w3_pad, w3_pad], axis=0).astype(jnp.bfloat16)
    b3_pad = jnp.pad(params["b3"], ((0, 0), (0, dout_pad - dout))).astype(jnp.float32)

    # fc1: pad the input (K) dimension to the K-tile multiple (zero rows add nothing).
    din = params["w1"].shape[0]
    _, din_pad, _ = _k_tiling(din)
    w1 = jnp.pad(params["w1"], ((0, din_pad - din), (0, 0))).astype(jnp.bfloat16)

    return {
        "w1": w1, "b1": params["b1"].astype(jnp.float32),
        "w_fused": w_fused, "b_fused": b_fused,
        "w3_stacked": w3_stacked, "b3_pad": b3_pad,
    }


def fc_reference(x, style_idx, p):
    """Plain-JAX f32 reference matching the PyTorch forward (unfused params)."""
    mid = _leaky_relu(x @ p["w1"] + p["b1"])
    h2 = _leaky_relu(mid @ p["w2"] + p["b2"])
    hr = _leaky_relu(mid @ p["res_w"][style_idx] + p["res_b"][style_idx])
    return _leaky_relu((h2 + hr) @ p["w3"] + p["b3"])


if __name__ == "__main__":
    input_length = 64
    output_length = 32
    max_style_num = 3
    batch = 8
    style_idx = 1

    key = jax.random.PRNGKey(0)
    k_params, k_x = jax.random.split(key)
    params = init_params(k_params, input_length, output_length, max_style_num)
    kparams = prepare_kernel_params(params)

    x = jax.random.normal(k_x, (batch, input_length), jnp.float32)
    style_num = jnp.array([style_idx], dtype=jnp.int32)

    out = fc_forward(x, style_num, kparams, output_length=output_length)
    out = jax.block_until_ready(out)

    ref = fc_reference(x, style_idx, params)
    assert out.shape == (batch, output_length)
    # bf16 weights/activation operands with f32 accumulation: tolerance loosened vs. pure-f32.
    max_err = float(jnp.max(jnp.abs(out - ref)))
    assert jnp.allclose(out, ref, atol=3e-2, rtol=3e-2), f"mismatch vs reference, max abs err={max_err}"

    print("KERNEL_OK")
</pallas_src>

<mosaic_0001>
module attributes {stable_mosaic.version = 11 : i64} {
  func.func @fc_kernel(%arg0: i32, %arg1: i32, %arg2: memref<1xi32, #tpu.memory_space<smem>>, %arg3: memref<8x64xf32, #tpu.memory_space<vmem>>, %arg4: memref<64x512xbf16, #tpu.memory_space<vmem>>, %arg5: memref<1x512xf32, #tpu.memory_space<vmem>>, %arg6: memref<1x512x256xbf16, #tpu.memory_space<vmem>>, %arg7: memref<1x1x256xf32, #tpu.memory_space<vmem>>, %arg8: memref<256x128xbf16, #tpu.memory_space<vmem>>, %arg9: memref<1x128xf32, #tpu.memory_space<vmem>>, %arg10: memref<8x128xf32, #tpu.memory_space<vmem>>, %arg11: memref<8x512xf32, #tpu.memory_space<vmem>>) attributes {dimension_semantics = [#tpu.dimension_semantics<parallel>, #tpu.dimension_semantics<arbitrary>], iteration_bounds = array<i64: 1, 1>, scalar_prefetch = 1 : i64, scratch_operands = 1 : i64, tpu.core_type = #tpu.core_type<tc>, window_params = [{transform_indices = @transform_0, window_bounds = array<i64: 8, 64>}, {pipeline_mode = #tpu.pipeline_mode<synchronous>, transform_indices = @transform_1, window_bounds = array<i64: 64, 512>}, {pipeline_mode = #tpu.pipeline_mode<synchronous>, transform_indices = @transform_2, window_bounds = array<i64: 1, 512>}, {pipeline_mode = #tpu.pipeline_mode<synchronous>, transform_indices = @transform_3, window_bounds = array<i64: 1, 512, 256>}, {pipeline_mode = #tpu.pipeline_mode<synchronous>, transform_indices = @transform_4, window_bounds = array<i64: 1, 1, 256>}, {pipeline_mode = #tpu.pipeline_mode<synchronous>, transform_indices = @transform_5, window_bounds = array<i64: 256, 128>}, {pipeline_mode = #tpu.pipeline_mode<synchronous>, transform_indices = @transform_6, window_bounds = array<i64: 1, 128>}, {transform_indices = @transform_7, window_bounds = array<i64: 8, 128>}]} {
    %c0_i32 = arith.constant 0 : i32
    %0 = arith.cmpi eq, %arg1, %c0_i32 : i32
    %1 = arith.extui %0 : i1 to i32
    %c0_i32_0 = arith.constant 0 : i32
    %2 = arith.cmpi ne, %1, %c0_i32_0 : i32
    scf.if %2 {
      %cst_10 = arith.constant 0.000000e+00 : f32
      %13 = vector.broadcast %cst_10 : f32 to vector<8x512xf32>
      %c0_11 = arith.constant 0 : index
      %c0_12 = arith.constant 0 : index
      %14 = vector.load %arg11[%c0_11, %c0_12] : memref<8x512xf32, #tpu.memory_space<vmem>>, vector<8x512xf32>
      tpu.vector_store %arg11[%c0_11, %c0_12], %13 {strides = array<i32>} : memref<8x512xf32, #tpu.memory_space<vmem>>, vector<8x512xf32>,
    } else {
    }
    %c0 = arith.constant 0 : index
    %c0_1 = arith.constant 0 : index
    %3 = vector.load %arg11[%c0, %c0_1] : memref<8x512xf32, #tpu.memory_space<vmem>>, vector<8x512xf32>
    %c0_2 = arith.constant 0 : index
    %c0_3 = arith.constant 0 : index
    %4 = vector.load %arg3[%c0_2, %c0_3] : memref<8x64xf32, #tpu.memory_space<vmem>>, vector<8x64xf32>
    %5 = arith.truncf %4 : vector<8x64xf32> to vector<8x64xbf16>
    %c0_4 = arith.constant 0 : index
    %c0_5 = arith.constant 0 : index
    %6 = vector.load %arg4[%c0_4, %c0_5] : memref<64x512xbf16, #tpu.memory_space<vmem>>, vector<64x512xbf16>
    %cst = arith.constant dense<0.000000e+00> : vector<8x512xf32>
    %7 = tpu.matmul %5, %6, %cst {dimension_numbers = #tpu.dot_dimension_numbers<[1], [0], [0], [1], [0, 0, 1, 1], [], []>} : vector<8x64xbf16>, vector<64x512xbf16>, vector<8x512xf32> -> vector<8x512xf32>
    %8 = arith.addf %3, %7 : vector<8x512xf32>
    %c0_6 = arith.constant 0 : index
    %c0_7 = arith.constant 0 : index
    %9 = vector.load %arg11[%c0_6, %c0_7] : memref<8x512xf32, #tpu.memory_space<vmem>>, vector<8x512xf32>
    tpu.vector_store %arg11[%c0_6, %c0_7], %8 {strides = array<i32>} : memref<8x512xf32, #tpu.memory_space<vmem>>, vector<8x512xf32>,
    %c0_i32_8 = arith.constant 0 : i32
    %10 = arith.cmpi eq, %arg1, %c0_i32_8 : i32
    %11 = arith.extui %10 : i1 to i32
    %c0_i32_9 = arith.constant 0 : i32
    %12 = arith.cmpi ne, %11, %c0_i32_9 : i32
    scf.if %12 {
      %c0_10 = arith.constant 0 : index
      %c0_11 = arith.constant 0 : index
      %13 = vector.load %arg11[%c0_10, %c0_11] : memref<8x512xf32, #tpu.memory_space<vmem>>, vector<8x512xf32>
      %c0_12 = arith.constant 0 : index
      %c0_13 = arith.constant 0 : index
      %14 = vector.load %arg5[%c0_12, %c0_13] : memref<1x512xf32, #tpu.memory_space<vmem>>, vector<1x512xf32>
      %15 = vector.broadcast %14 : vector<1x512xf32> to vector<8x512xf32>
      %16 = arith.addf %13, %15 : vector<8x512xf32>
      %cst_14 = arith.constant 2.000000e-01 : f32
      %17 = vector.broadcast %cst_14 : f32 to vector<8x512xf32>
      %18 = arith.mulf %17, %16 : vector<8x512xf32>
      %19 = arith.maximumf %16, %18 : vector<8x512xf32>
      %20 = arith.truncf %19 : vector<8x512xf32> to vector<8x512xbf16>
      %c0_15 = arith.constant 0 : index
      %c0_16 = arith.constant 0 : index
      %c0_17 = arith.constant 0 : index
      %21 = vector.load %arg6[%c0_15, %c0_16, %c0_17] : memref<1x512x256xbf16, #tpu.memory_space<vmem>>, vector<1x512x256xbf16>
      %22 = vector.shape_cast %21 : vector<1x512x256xbf16> to vector<512x256xbf16>
      %cst_18 = arith.constant dense<0.000000e+00> : vector<8x256xf32>
      %23 = tpu.matmul %20, %22, %cst_18 {dimension_numbers = #tpu.dot_dimension_numbers<[1], [0], [0], [1], [0, 0, 1, 1], [], []>} : vector<8x512xbf16>, vector<512x256xbf16>, vector<8x256xf32> -> vector<8x256xf32>
      %c0_19 = arith.constant 0 : index
      %c0_20 = arith.constant 0 : index
      %c0_21 = arith.constant 0 : index
      %24 = vector.load %arg7[%c0_19, %c0_20, %c0_21] : memref<1x1x256xf32, #tpu.memory_space<vmem>>, vector<1x1x256xf32>
      %25 = vector.shape_cast %24 : vector<1x1x256xf32> to vector<1x256xf32>
      %26 = vector.broadcast %25 : vector<1x256xf32> to vector<8x256xf32>
      %27 = arith.addf %23, %26 : vector<8x256xf32>
      %cst_22 = arith.constant 2.000000e-01 : f32
      %28 = vector.broadcast %cst_22 : f32 to vector<8x256xf32>
      %29 = arith.mulf %28, %27 : vector<8x256xf32>
      %30 = arith.maximumf %27, %29 : vector<8x256xf32>
      %31 = arith.truncf %30 : vector<8x256xf32> to vector<8x256xbf16>
      %c0_23 = arith.constant 0 : index
      %c0_24 = arith.constant 0 : index
      %32 = vector.load %arg8[%c0_23, %c0_24] : memref<256x128xbf16, #tpu.memory_space<vmem>>, vector<256x128xbf16>
      %cst_25 = arith.constant dense<0.000000e+00> : vector<8x128xf32>
      %33 = tpu.matmul %31, %32, %cst_25 {dimension_numbers = #tpu.dot_dimension_numbers<[1], [0], [0], [1], [0, 0, 1, 1], [], []>} : vector<8x256xbf16>, vector<256x128xbf16>, vector<8x128xf32> -> vector<8x128xf32>
      %c0_26 = arith.constant 0 : index
      %c0_27 = arith.constant 0 : index
      %34 = vector.load %arg9[%c0_26, %c0_27] : memref<1x128xf32, #tpu.memory_space<vmem>>, vector<1x128xf32>
      %35 = vector.broadcast %34 : vector<1x128xf32> to vector<8x128xf32>
      %36 = arith.addf %33, %35 : vector<8x128xf32>
      %cst_28 = arith.constant 2.000000e-01 : f32
      %37 = vector.broadcast %cst_28 : f32 to vector<8x128xf32>
      %38 = arith.mulf %37, %36 : vector<8x128xf32>
      %39 = arith.maximumf %36, %38 : vector<8x128xf32>
      %c0_29 = arith.constant 0 : index
      %c0_30 = arith.constant 0 : index
      %40 = vector.load %arg10[%c0_29, %c0_30] : memref<8x128xf32, #tpu.memory_space<vmem>>, vector<8x128xf32>
      tpu.vector_store %arg10[%c0_29, %c0_30], %39 {strides = array<i32>} : memref<8x128xf32, #tpu.memory_space<vmem>>, vector<8x128xf32>,
    } else {
    }
    return
  }
  func.func @transform_0(%arg0: i32, %arg1: i32, %arg2: memref<1xi32, #tpu.memory_space<smem>>) -> (i32, i32) {
    %c0_i32 = arith.constant 0 : i32
    return %arg0, %arg1 : i32, i32
  }
  func.func @transform_1(%arg0: i32, %arg1: i32, %arg2: memref<1xi32, #tpu.memory_space<smem>>) -> (i32, i32) {
    %c0_i32 = arith.constant 0 : i32
    %c0_i32_0 = arith.constant 0 : i32
    return %arg1, %c0_i32 : i32, i32
  }
  func.func @transform_2(%arg0: i32, %arg1: i32, %arg2: memref<1xi32, #tpu.memory_space<smem>>) -> (i32, i32) {
    %c0_i32 = arith.constant 0 : i32
    %c0_i32_0 = arith.constant 0 : i32
    %c0_i32_1 = arith.constant 0 : i32
    return %c0_i32, %c0_i32_0 : i32, i32
  }
  func.func @transform_3(%arg0: i32, %arg1: i32, %arg2: memref<1xi32, #tpu.memory_space<smem>>) -> (i32, i32, i32) {
    %c0 = arith.constant 0 : index
    %0 = memref.load %arg2[%c0] : memref<1xi32, #tpu.memory_space<smem>>
    %c0_i32 = arith.constant 0 : i32
    %c0_i32_0 = arith.constant 0 : i32
    %c0_i32_1 = arith.constant 0 : i32
    return %0, %c0_i32, %c0_i32_0 : i32, i32, i32
  }
  func.func @transform_4(%arg0: i32, %arg1: i32, %arg2: memref<1xi32, #tpu.memory_space<smem>>) -> (i32, i32, i32) {
    %c0 = arith.constant 0 : index
    %0 = memref.load %arg2[%c0] : memref<1xi32, #tpu.memory_space<smem>>
    %c0_i32 = arith.constant 0 : i32
    %c0_i32_0 = arith.constant 0 : i32
    %c0_i32_1 = arith.constant 0 : i32
    return %0, %c0_i32, %c0_i32_0 : i32, i32, i32
  }
  func.func @transform_5(%arg0: i32, %arg1: i32, %arg2: memref<1xi32, #tpu.memory_space<smem>>) -> (i32, i32) {
    %c0_i32 = arith.constant 0 : i32
    %c0_i32_0 = arith.constant 0 : i32
    %c0_i32_1 = arith.constant 0 : i32
    return %c0_i32, %c0_i32_0 : i32, i32
  }
  func.func @transform_6(%arg0: i32, %arg1: i32, %arg2: memref<1xi32, #tpu.memory_space<smem>>) -> (i32, i32) {
    %c0_i32 = arith.constant 0 : i32
    %c0_i32_0 = arith.constant 0 : i32
    %c0_i32_1 = arith.constant 0 : i32
    return %c0_i32, %c0_i32_0 : i32, i32
  }
  func.func @transform_7(%arg0: i32, %arg1: i32, %arg2: memref<1xi32, #tpu.memory_space<smem>>) -> (i32, i32) {
    %c0_i32 = arith.constant 0 : i32
    %c0_i32_0 = arith.constant 0 : i32
    return %arg0, %c0_i32 : i32, i32
  }
}

</mosaic_0001>

<bundles_post_ra>
// kernel: fc_forward.1
= control target key start
LH: loop header
LB: loop body
LE: loop exit
PB: predicated region body
PF: predicated region fallthrough
CT: control target
= control target key end

     0   :  { %14 = vsyncpa [#allocation6], 0  ;;  %s1809_s0 = inlined_call_operand.<no memory space> [shape: s32[1], index: 0, kind: input, shape index: {}]   ;;  %s1810_s1 = inlined_call_operand.hbm [shape: f32[8,64], index: 1, kind: input, shape index: {}]   ;;  %s1811_s2 = inlined_call_operand.hbm [shape: bf16[64,512], index: 2, kind: input, shape index: {}]   ;;  %s1812_s3 = inlined_call_operand.hbm [shape: f32[1,512], index: 3, kind: input, shape index: {}]   ;;  %s1813_s4 = inlined_call_operand.hbm [shape: bf16[3,512,256], index: 4, kind: input, shape index: {}]   ;;  %s1814_s5 = inlined_call_operand.hbm [shape: f32[3,1,256], index: 5, kind: input, shape index: {}]   ;;  %s1815_s6 = inlined_call_operand.hbm [shape: bf16[256,128], index: 6, kind: input, shape index: {}]   ;;  %s1816_s7 = inlined_call_operand.vmem [shape: f32[1,128], index: 7, kind: input, shape index: {}]   ;;  %s1817_s8 = inlined_call_operand.hbm [shape: f32[8,128], index: 8, kind: output, shape index: {}]  }
   0x1   :  { %15 = vsyncpa [#allocation9], 0 }
   0x2   :  { %16 = vsyncpa [#allocation12], 0 }
   0x3   :  { %17 = vsyncpa [#allocation15], 0  ;;  %s34_s29 = sshll.u32 %s1811_s2, 4  ;;  %s35_s29 = int_to_ptr.hbm [resolvable:$true] %s34_s29 }
   0x4   :  { %18 = vsyncpa [#allocation7], 0  ;;  %s1699_s30 = smov [#allocation8]   ;;  %s1410_s12 = sshll.u32 %s1809_s0, 9 }
   0x5   :  { %s36_s9 = sshll.u32 %s1699_s30, 4  ;;  %s1700_s13 = smov 256   ;;  %s37_s9 = int_to_ptr.vmem [resolvable:$true] %s36_s9 }
   0x6   :  { %s1701_s14 = smov 16   ;;  %s61_s17 = scalar_lea.hbm %s1813_s4, %s1410_s12 }
   0x7   :  { %42 = dma.hbm_to_vmem [thread:$0]  %s35_s29, 2048, %s37_s9, [#allocation9], %s1700_s13, %s1700_s13, %s1701_s14  }
   0x8   :  { %s62_s18 = sshll.u32 %s61_s17, 4  ;;  %s1702_s19 = smov [#allocation11]   ;;  %s63_s18 = int_to_ptr.hbm [resolvable:$true] %s62_s18 }
   0x9   :  { %s64_s20 = sshll.u32 %s1702_s19, 4  ;;  %s1545_s2 = sshra.s32 %s63_s18, 4  ;;  %s65_s20 = int_to_ptr.vmem [resolvable:$true] %s64_s20  ;;  %s1546_s2 = int_to_ptr.hbm [resolvable:$true] %s1545_s2 }
   0xa   :  { %s1547_s21 = scalar_lea.hbm %s1546_s2, 512  ;;  %s1549_s24 = scalar_lea.hbm %s1813_s4, 1536 }
   0xb   :  { %p1548_p0 = scmp.ne.s32.totalorder %s1546_s2, %s1547_s21  ;;  %p1550_p1 = scmp.lt.s32.totalorder %s1546_s2, %s1813_s4 }
   0xc   :  { %p1551_p2 = scmp.lt.s32.totalorder %s1549_s24, %s1547_s21 }
   0xe   :  { %p1552_p3 = por %p1551_p2, %p1550_p1 }
  0x10   :  { %p1553_p4 = pnand %p1552_p3, %p1548_p0 }
  0x12   :  { %1556 = shalt.err (!%p1553_p4)
}
  0x13   :  { %s1703_s27 = smov 128   ;;  %s1704_s28 = smov 8  }
  0x14   :  { %70 = dma.hbm_to_vmem [thread:$0]  %s63_s18, 8192, %s65_s20, [#allocation12], %s1703_s27, %s1703_s27, %s1704_s28  }
  0x15   :  { %s24_s9 = sshll.u32 %s1810_s1, 4  ;;  %s1705_s10 = smov [#allocation5]   ;;  %s25_s9 = int_to_ptr.hbm [resolvable:$true] %s24_s9 }
  0x16   :  { %s26_s11 = sshll.u32 %s1705_s10, 4  ;;  %s48_s14 = sshll.u32 %s1812_s3, 4  ;;  %s27_s11 = int_to_ptr.vmem [resolvable:$true] %s26_s11  ;;  %s49_s14 = int_to_ptr.hbm [resolvable:$true] %s48_s14 }
  0x17   :  { %29 = dma.hbm_to_vmem [thread:$0]  %s25_s9, 128, %s27_s11, [#allocation6]  }
  0x18   :  { %s1706_s4 = smov [#allocation10]   ;;  %s1021_s18 = sshll.u32 %s1809_s0, 1 }
  0x19   :  { %s50_s15 = sshll.u32 %s1706_s4, 4  ;;  %s77_s1 = scalar_lea.hbm %s1814_s5, %s1021_s18  ;;  %s51_s15 = int_to_ptr.vmem [resolvable:$true] %s50_s15 }
  0x1a   :  { %53 = dma.hbm_to_vmem [thread:$0]  %s49_s14, 64, %s51_s15, [#allocation9]  }
  0x1b   :  { %s79_s2 = sshll.u32 %s77_s1, 4  ;;  %s1707_s21 = smov [#allocation13]   ;;  %s80_s2 = int_to_ptr.hbm [resolvable:$true] %s79_s2 }
  0x1c   :  { %s81_s22 = sshll.u32 %s1707_s21, 4  ;;  %s89_s24 = sshll.u32 %s1815_s6, 4  ;;  %s82_s22 = int_to_ptr.vmem [resolvable:$true] %s81_s22  ;;  %s90_s24 = int_to_ptr.hbm [resolvable:$true] %s89_s24 }
  0x1d   :  { %s1617_s25 = sshra.s32 %s80_s2, 4  ;;  %s1621_s28 = scalar_lea.hbm %s1814_s5, 6  ;;  %s1618_s25 = int_to_ptr.hbm [resolvable:$true] %s1617_s25 }
  0x1e   :  { %s1619_s26 = scalar_lea.hbm %s1618_s25, 2  ;;  %p1622_p6 = scmp.lt.s32.totalorder %s1618_s25, %s1814_s5 }
  0x1f   :  { %p1620_p5 = scmp.ne.s32.totalorder %s1618_s25, %s1619_s26  ;;  %p1623_p7 = scmp.lt.s32.totalorder %s1621_s28, %s1619_s26 }
  0x21   :  { %p1624_p8 = por %p1623_p7, %p1622_p6 }
  0x23   :  { %p1625_p9 = pnand %p1624_p8, %p1620_p5 }
  0x25   :  { %1628 = shalt.err (!%p1625_p9)
}
  0x26   :  { %84 = dma.hbm_to_vmem [thread:$0]  %s80_s2, 32, %s82_s22, [#allocation12]  }
  0x27   :  { %s1708_s9 = smov [#allocation14]   ;;  %s1709_s10 = smov 64  }
  0x28   :  { %s91_s6 = sshll.u32 %s1708_s9, 4  ;;  %s1710_s11 = smov 4   ;;  %s92_s6 = int_to_ptr.vmem [resolvable:$true] %s91_s6 }
  0x29   :  { %97 = dma.hbm_to_vmem [thread:$0]  %s90_s24, 2048, %s92_s6, [#allocation15], %s1709_s10, %s1709_s10, %s1710_s11  }
  0x2a   :  { %1689 = dma.done.wait [#allocation6], 128  }
  0x2b   :  { %1690 = vsyncadd [#allocation6], 4294967168 }
  0x2c   :  { %1691 = dma.done.wait [#allocation9], 2112  }
  0x2d   :  { %1692 = vsyncadd [#allocation9], 4294965184 }
  0x2e   :  { %1693 = dma.done.wait [#allocation12], 8224  }
  0x2f   :  { %1694 = vsyncadd [#allocation12], 4294959072 }
  0x30   :  { %1695 = dma.done.wait [#allocation15], 2048  }
  0x31   :  { %1696 = vsyncadd [#allocation15], 4294965248  ;;  %v1072_v0 = vld [vmem:[#allocation8 + $0x60] sm:$0xf]  ;;  %v1425_v1 = vld [vmem:[#allocation8 + $0x6c] sm:$0xf0] }
  0x32   :  { %v1423_v2 = vld [vmem:[#allocation8 + $0x64] sm:$0xf]  ;;  %v1073_v3 = vor.u32 %v1425_v1, %v1072_v0  ;;  %v1074_v4 = vld [vmem:[#allocation8 + $0x70] sm:$0xf0]  ;;  %v1056_v5 = vld [vmem:[#allocation8 + $0x40] sm:$0xf] }
  0x33   :  { %v1421_v6 = vld [vmem:[#allocation8 + $0x4c] sm:$0xf0]  ;;  %v1077_v7 = vor.u32 %v1423_v2, %v1074_v4  ;;  %v1419_v8 = vld [vmem:[#allocation8 + $0x44] sm:$0xf]  ;;  %v1058_v9 = vld [vmem:[#allocation8 + $0x50] sm:$0xf0] }
  0x34   :  { %245 = vmatpush.bf16.msra.mxu2 %v1073_v3  ;;  %v1057_v10 = vor.u32 %v1421_v6, %v1056_v5  ;;  %v1061_v11 = vor.u32 %v1419_v8, %v1058_v9  ;;  %v1040_v12 = vld [vmem:[#allocation8 + $0x20] sm:$0xf]  ;;  %v1417_v13 = vld [vmem:[#allocation8 + $0x2c] sm:$0xf0]  ;;  %v1415_v14 = vld [vmem:[#allocation8 + $0x24] sm:$0xf] }
  0x35   :  { %258 = vmatpush.bf16.msra.mxu3 %v1077_v7  ;;  %v1042_v15 = vld [vmem:[#allocation8 + $0x30] sm:$0xf0]  ;;  %v1041_v16 = vor.u32 %v1417_v13, %v1040_v12  ;;  %v1024_v18 = vld [vmem:[#allocation8] sm:$0xf]  ;;  %v1413_v19 = vld [vmem:[#allocation8 + $0xc] sm:$0xf0] }
  0x36   :  { %v1045_v17 = vor.u32 %v1415_v14, %v1042_v15  ;;  %v1411_v20 = vld [vmem:[#allocation8 + $0x4] sm:$0xf]  ;;  %v1026_v21 = vld [vmem:[#allocation8 + $0x10] sm:$0xf0]  ;;  %v1080_v22 = vld [vmem:[#allocation8 + $0x68] sm:$0xf]  ;;  %v1025_v27 = vor.u32 %v1413_v19, %v1024_v18 }
  0x37   :  { %v1426_v23 = vld [vmem:[#allocation8 + $0x74] sm:$0xf0]  ;;  %v1424_v25 = vld [vmem:[#allocation8 + $0x6c] sm:$0xf]  ;;  %v1082_v26 = vld [vmem:[#allocation8 + $0x78] sm:$0xf0]  ;;  %v1029_v32 = vor.u32 %v1411_v20, %v1026_v21 }
  0x38   :  { %246 = vmatpush.bf16.msra.mxu2 %v1057_v10  ;;  %v139_v24 = vld [vmem:[#allocation5] sm:$0xff]  ;;  %v1064_v28 = vld [vmem:[#allocation8 + $0x48] sm:$0xf]  ;;  %v1148_v29 = vld [vmem:[#allocation11 + $0x70] sm:$0xf]  ;;  %v1081_v33 = vor.u32 %v1426_v23, %v1080_v22  ;;  %v1085_v38 = vor.u32 %v1424_v25, %v1082_v26  ;;  %vm237_vm0 = vcmask 523264  }
  0x39   :  { %259 = vmatpush.bf16.msra.mxu3 %v1061_v11  ;;  %v1442_v30 = vld [vmem:[#allocation11 + $0x74] sm:$0xf0]  ;;  %v1212_v31 = vld [vmem:[#allocation11 + $0xf0] sm:$0xf]  ;;  %v1140_v36 = vld [vmem:[#allocation11 + $0x60] sm:$0xf]  ;;  %v1793_v43 = vpack.c.bf16 %v139_v24, %v139_v24 }
  0x3a   :  { %v1149_v34 = vor.u32 %v1442_v30, %v1148_v29  ;;  %v1458_v35 = vld [vmem:[#allocation11 + $0xf4] sm:$0xf0]  ;;  %v1440_v37 = vld [vmem:[#allocation11 + $0x64] sm:$0xf0]  ;;  %v1422_v39 = vld [vmem:[#allocation8 + $0x54] sm:$0xf0] }
  0x3b   :  { %v1213_v40 = vor.u32 %v1458_v35, %v1212_v31  ;;  %v1204_v41 = vld [vmem:[#allocation11 + $0xe0] sm:$0xf]  ;;  %v1456_v42 = vld [vmem:[#allocation11 + $0xe4] sm:$0xf0]  ;;  %v1066_v45 = vld [vmem:[#allocation8 + $0x58] sm:$0xf0]  ;;  %v1141_v46 = vor.u32 %v1440_v37, %v1140_v36  ;;  %v1065_v50 = vor.u32 %v1422_v39, %v1064_v28 }
  0x3c   :  { %247 = vmatpush.bf16.msra.mxu2 %v1041_v16  ;;  %v1420_v44 = vld [vmem:[#allocation8 + $0x4c] sm:$0xf]  ;;  %724 = vmatpush.bf16.msra.mxu0 %v1149_v34  ;;  %v1205_v47 = vor.u32 %v1456_v42, %v1204_v41  ;;  %v1132_v48 = vld [vmem:[#allocation11 + $0x50] sm:$0xf]  ;;  %v1438_v49 = vld [vmem:[#allocation11 + $0x54] sm:$0xf0] }
  0x3d   :  { %260 = vmatpush.bf16.msra.mxu3 %v1045_v17  ;;  %737 = vmatpush.bf16.msra.mxu1 %v1213_v40  ;;  %v1196_v51 = vld [vmem:[#allocation11 + $0xd0] sm:$0xf]  ;;  %v1454_v52 = vld [vmem:[#allocation11 + $0xd4] sm:$0xf0]  ;;  %v1069_v53 = vor.u32 %v1420_v44, %v1066_v45  ;;  %v1048_v54 = vld [vmem:[#allocation8 + $0x28] sm:$0xf]  ;;  %v1133_v58 = vor.u32 %v1438_v49, %v1132_v48 }
  0x3e   :  { %v1418_v55 = vld [vmem:[#allocation8 + $0x34] sm:$0xf0]  ;;  %v1416_v56 = vld [vmem:[#allocation8 + $0x2c] sm:$0xf]  ;;  %v1050_v57 = vld [vmem:[#allocation8 + $0x38] sm:$0xf0]  ;;  %v1197_v59 = vor.u32 %v1454_v52, %v1196_v51 }
  0x3f   :  { %v1124_v60 = vld [vmem:[#allocation11 + $0x40] sm:$0xf]  ;;  %v1436_v61 = vld [vmem:[#allocation11 + $0x44] sm:$0xf0]  ;;  %v1049_v62 = vor.u32 %v1418_v55, %v1048_v54  ;;  %v1032_v63 = vld [vmem:[#allocation8 + $0x8] sm:$0xf]  ;;  %v1053_v2 = vor.u32 %v1416_v56, %v1050_v57 }
  0x40   :  { %248 = vmatpush.bf16.msra.mxu2 %v1025_v27  ;;  %725 = vmatpush.bf16.msra.mxu0 %v1141_v46  ;;  %v1188_v0 = vld [vmem:[#allocation11 + $0xc0] sm:$0xf]  ;;  %v1452_v1 = vld [vmem:[#allocation11 + $0xc4] sm:$0xf0]  ;;  %v1414_v3 = vld [vmem:[#allocation8 + $0x14] sm:$0xf0]  ;;  %v1125_v6 = vor.u32 %v1436_v61, %v1124_v60 }
  0x41   :  { %261 = vmatpush.bf16.msra.mxu3 %v1029_v32  ;;  %738 = vmatpush.bf16.msra.mxu1 %v1205_v47  ;;  %v1412_v4 = vld [vmem:[#allocation8 + $0xc] sm:$0xf]  ;;  %v1034_v5 = vld [vmem:[#allocation8 + $0x18] sm:$0xf0]  ;;  %v1116_v7 = vld [vmem:[#allocation11 + $0x30] sm:$0xf]  ;;  %v1189_v10 = vor.u32 %v1452_v1, %v1188_v0  ;;  %v1033_v14 = vor.u32 %v1414_v3, %v1032_v63 }
  0x42   :  { %v1276_v8 = vld [vmem:[#allocation11 + $0x170] sm:$0xf]  ;;  %v1474_v9 = vld [vmem:[#allocation11 + $0x174] sm:$0xf0]  ;;  %v1037_v17 = vor.u32 %v1412_v4, %v1034_v5  ;;  %v1268_v21 = vld [vmem:[#allocation11 + $0x160] sm:$0xf] }
  0x43   :  { %1086 = vmatmul.msk.bf16.vlgmr.msra.gmra.mxu2 %vm237_vm0, %v1793_v43  ;;  %v1434_v11 = vld [vmem:[#allocation11 + $0x34] sm:$0xf0]  ;;  %v1340_v12 = vld [vmem:[#allocation11 + $0x1f0] sm:$0xf]  ;;  %v1277_v18 = vor.u32 %v1474_v9, %v1276_v8  ;;  %v1472_v22 = vld [vmem:[#allocation11 + $0x164] sm:$0xf0] }
  0x44   :  { %271 = vmatpush.bf16.msrb.mxu2 %v1081_v33  ;;  %1087 = vmatmul.msk.bf16.vlgmr.msra.gmra.mxu3 %vm237_vm0, %v1793_v43  ;;  %v1490_v13 = vld [vmem:[#allocation11 + $0x1f4] sm:$0xf0]  ;;  %v1180_v15 = vld [vmem:[#allocation11 + $0xb0] sm:$0xf]  ;;  %v1117_v19 = vor.u32 %v1434_v11, %v1116_v7  ;;  %v1108_v24 = vld [vmem:[#allocation11 + $0x20] sm:$0xf]  ;;  %v1269_v28 = vor.u32 %v1472_v22, %v1268_v21 }
  0x45   :  { %284 = vmatpush.bf16.msrb.mxu3 %v1085_v38  ;;  %726 = vmatpush.bf16.msra.mxu0 %v1133_v58  ;;  %v1450_v16 = vld [vmem:[#allocation11 + $0xb4] sm:$0xf0]  ;;  %v1341_v20 = vor.u32 %v1490_v13, %v1340_v12  ;;  %v1432_v25 = vld [vmem:[#allocation11 + $0x24] sm:$0xf0]  ;;  %v1172_v26 = vld [vmem:[#allocation11 + $0xa0] sm:$0xf] }
  0x46   :  { %739 = vmatpush.bf16.msra.mxu1 %v1197_v59  ;;  %v1181_v23 = vor.u32 %v1450_v16, %v1180_v15  ;;  %v1448_v27 = vld [vmem:[#allocation11 + $0xa4] sm:$0xf0]  ;;  %v1332_v29 = vld [vmem:[#allocation11 + $0x1e0] sm:$0xf]  ;;  %v1109_v31 = vor.u32 %v1432_v25, %v1108_v24  ;;  %v1260_v32 = vld [vmem:[#allocation11 + $0x150] sm:$0xf] }
  0x47   :  { %v1488_v30 = vld [vmem:[#allocation11 + $0x1e4] sm:$0xf0]  ;;  %v1470_v33 = vld [vmem:[#allocation11 + $0x154] sm:$0xf0]  ;;  %v1173_v34 = vor.u32 %v1448_v27, %v1172_v26  ;;  %v1100_v35 = vld [vmem:[#allocation11 + $0x10] sm:$0xf] }
  0x48   :  { %272 = vmatpush.bf16.msrb.mxu2 %v1065_v50  ;;  %v1430_v36 = vld [vmem:[#allocation11 + $0x14] sm:$0xf0]  ;;  %v1333_v37 = vor.u32 %v1488_v30, %v1332_v29  ;;  %v1164_v38 = vld [vmem:[#allocation11 + $0x90] sm:$0xf]  ;;  %v1261_v40 = vor.u32 %v1470_v33, %v1260_v32  ;;  %v1092_v45 = vld [vmem:[#allocation11] sm:$0xf] }
  0x49   :  { %285 = vmatpush.bf16.msrb.mxu3 %v1069_v53  ;;  %727 = vmatpush.bf16.msra.mxu0 %v1125_v6  ;;  %v1446_v39 = vld [vmem:[#allocation11 + $0x94] sm:$0xf0]  ;;  %v1324_v41 = vld [vmem:[#allocation11 + $0x1d0] sm:$0xf]  ;;  %v1101_v44 = vor.u32 %v1430_v36, %v1100_v35  ;;  %v1252_v46 = vld [vmem:[#allocation11 + $0x140] sm:$0xf] }
  0x4a   :  { %740 = vmatpush.bf16.msra.mxu1 %v1189_v10  ;;  %v1486_v42 = vld [vmem:[#allocation11 + $0x1d4] sm:$0xf0]  ;;  %v1468_v47 = vld [vmem:[#allocation11 + $0x144] sm:$0xf0]  ;;  %v1165_v48 = vor.u32 %v1446_v39, %v1164_v38  ;;  %v1156_v50 = vld [vmem:[#allocation11 + $0x80] sm:$0xf] }
  0x4b   :  { %v1428_v49 = vld [vmem:[#allocation11 + $0x4] sm:$0xf0]  ;;  %v1325_v52 = vor.u32 %v1486_v42, %v1324_v41  ;;  %v1316_v53 = vld [vmem:[#allocation11 + $0x1c0] sm:$0xf]  ;;  %v1441_v54 = vld [vmem:[#allocation11 + $0x74] sm:$0xf]  ;;  %v1253_v56 = vor.u32 %v1468_v47, %v1252_v46 }
  0x4c   :  { %273 = vmatpush.bf16.msrb.mxu2 %v1049_v62  ;;  %v1444_v51 = vld [vmem:[#allocation11 + $0x84] sm:$0xf0]  ;;  %v1150_v55 = vld [vmem:[#allocation11 + $0x78] sm:$0xf0]  ;;  %v1457_v58 = vld [vmem:[#allocation11 + $0xf4] sm:$0xf]  ;;  %v1093_v60 = vor.u32 %v1428_v49, %v1092_v45 }
  0x4d   :  { %286 = vmatpush.bf16.msrb.mxu3 %v1053_v2  ;;  %728 = vmatpush.bf16.msra.mxu0 %v1117_v19  ;;  %v1484_v57 = vld [vmem:[#allocation11 + $0x1c4] sm:$0xf0]  ;;  %v1214_v59 = vld [vmem:[#allocation11 + $0xf8] sm:$0xf0]  ;;  %v1244_v61 = vld [vmem:[#allocation11 + $0x130] sm:$0xf]  ;;  %v1153_v63 = vor.u32 %v1441_v54, %v1150_v55 }
  0x4e   :  { %741 = vmatpush.bf16.msra.mxu1 %v1181_v23  ;;  %v1466_v62 = vld [vmem:[#allocation11 + $0x134] sm:$0xf0]  ;;  %v1317_v0 = vor.u32 %v1484_v57, %v1316_v53  ;;  %v1217_v1 = vor.u32 %v1457_v58, %v1214_v59  ;;  %v1308_v2 = vld [vmem:[#allocation11 + $0x1b0] sm:$0xf]  ;;  %v1439_v3 = vld [vmem:[#allocation11 + $0x64] sm:$0xf] }
  0x4f   :  { %v1142_v4 = vld [vmem:[#allocation11 + $0x68] sm:$0xf0]  ;;  %v1245_v5 = vor.u32 %v1466_v62, %v1244_v61  ;;  %v1482_v6 = vld [vmem:[#allocation11 + $0x1b4] sm:$0xf0]  ;;  %v1455_v7 = vld [vmem:[#allocation11 + $0xe4] sm:$0xf] }
  0x50   :  { %274 = vmatpush.bf16.msrb.mxu2 %v1033_v14  ;;  %v1206_v8 = vld [vmem:[#allocation11 + $0xe8] sm:$0xf0]  ;;  %v1145_v9 = vor.u32 %v1439_v3, %v1142_v4  ;;  %v1309_v10 = vor.u32 %v1482_v6, %v1308_v2  ;;  %v1236_v12 = vld [vmem:[#allocation11 + $0x120] sm:$0xf]  ;;  %v1464_v13 = vld [vmem:[#allocation11 + $0x124] sm:$0xf0] }
  0x51   :  { %287 = vmatpush.bf16.msrb.mxu3 %v1037_v17  ;;  %729 = vmatpush.bf16.msra.mxu0 %v1109_v31  ;;  %v1209_v11 = vor.u32 %v1455_v7, %v1206_v8  ;;  %v1237_v14 = vor.u32 %v1464_v13, %v1236_v12  ;;  %v1300_v15 = vld [vmem:[#allocation11 + $0x1a0] sm:$0xf]  ;;  %v1480_v16 = vld [vmem:[#allocation11 + $0x1a4] sm:$0xf0]  ;;  %v1134_v19 = vld [vmem:[#allocation11 + $0x58] sm:$0xf0] }
  0x52   :  { %742 = vmatpush.bf16.msra.mxu1 %v1173_v34  ;;  %v1301_v17 = vor.u32 %v1480_v16, %v1300_v15  ;;  %v1198_v22 = vld [vmem:[#allocation11 + $0xd8] sm:$0xf0]  ;;  %v1228_v24 = vld [vmem:[#allocation11 + $0x110] sm:$0xf]  ;;  %v1462_v25 = vld [vmem:[#allocation11 + $0x114] sm:$0xf0] }
  0x53   :  { %1088 = vmatmul.msk.bf16.vlgmr.msrb.gmra.mxu2 %vm237_vm0, %v1793_v43  ;;  %v1292_v26 = vld [vmem:[#allocation11 + $0x190] sm:$0xf]  ;;  %v1229_v27 = vor.u32 %v1462_v25, %v1228_v24  ;;  %v1435_v29 = vld [vmem:[#allocation11 + $0x44] sm:$0xf]  ;;  %v1126_v30 = vld [vmem:[#allocation11 + $0x48] sm:$0xf0] }
  0x54   :  { %750 = vmatpush.bf16.msra.mxu2 %v1277_v18  ;;  %1089 = vmatmul.msk.bf16.vlgmr.msrb.gmra.mxu3 %vm237_vm0, %v1793_v43  ;;  %v1157_v43 = vor.u32 %v1444_v51, %v1156_v50  ;;  %v1437_v18 = vld [vmem:[#allocation11 + $0x54] sm:$0xf]  ;;  %v1129_v32 = vor.u32 %v1435_v29, %v1126_v30  ;;  %v1451_v33 = vld [vmem:[#allocation11 + $0xc4] sm:$0xf]  ;;  %v1190_v34 = vld [vmem:[#allocation11 + $0xc8] sm:$0xf0] }
  0x55   :  { %763 = vmatpush.bf16.msra.mxu3 %v1341_v20  ;;  %730 = vmatpush.bf16.msra.mxu0 %v1101_v44  ;;  %v1453_v20 = vld [vmem:[#allocation11 + $0xd4] sm:$0xf]  ;;  %v1137_v21 = vor.u32 %v1437_v18, %v1134_v19  ;;  %v1193_v35 = vor.u32 %v1451_v33, %v1190_v34  ;;  %v1220_v36 = vld [vmem:[#allocation11 + $0x100] sm:$0xf]  ;;  %v1118_v42 = vld [vmem:[#allocation11 + $0x38] sm:$0xf0] }
  0x56   :  { %743 = vmatpush.bf16.msra.mxu1 %v1165_v48  ;;  %v1201_v23 = vor.u32 %v1453_v20, %v1198_v22  ;;  %v1284_v38 = vld [vmem:[#allocation11 + $0x180] sm:$0xf]  ;;  %v1433_v41 = vld [vmem:[#allocation11 + $0x34] sm:$0xf]  ;;  %v1182_v47 = vld [vmem:[#allocation11 + $0xb8] sm:$0xf0] }
  0x57   :  { %v1121_v45 = vor.u32 %v1433_v41, %v1118_v42  ;;  %v1449_v46 = vld [vmem:[#allocation11 + $0xb4] sm:$0xf]  ;;  %v1278_v50 = vld [vmem:[#allocation11 + $0x178] sm:$0xf0]  ;;  %v1431_v55 = vld [vmem:[#allocation11 + $0x24] sm:$0xf] }
  0x58   :  { %751 = vmatpush.bf16.msra.mxu2 %v1269_v28  ;;  %v1478_v28 = vld [vmem:[#allocation11 + $0x194] sm:$0xf0]  ;;  %v1473_v48 = vld [vmem:[#allocation11 + $0x174] sm:$0xf]  ;;  %v1185_v49 = vor.u32 %v1449_v46, %v1182_v47  ;;  %v1447_v57 = vld [vmem:[#allocation11 + $0xa4] sm:$0xf] }
  0x59   :  { %764 = vmatpush.bf16.msra.mxu3 %v1333_v37  ;;  %731 = vmatpush.bf16.msra.mxu0 %v1093_v60  ;;  %v1293_v31 = vor.u32 %v1478_v28, %v1292_v26  ;;  %v1460_v37 = vld [vmem:[#allocation11 + $0x104] sm:$0xf0]  ;;  %v1489_v51 = vld [vmem:[#allocation11 + $0x1f4] sm:$0xf]  ;;  %v1281_v53 = vor.u32 %v1473_v48, %v1278_v50  ;;  %v1174_v59 = vld [vmem:[#allocation11 + $0xa8] sm:$0xf0] }
  0x5a   :  { %744 = vmatpush.bf16.msra.mxu1 %v1157_v43  ;;  %v1221_v39 = vor.u32 %v1460_v37, %v1220_v36  ;;  %v1471_v60 = vld [vmem:[#allocation11 + $0x164] sm:$0xf]  ;;  %v1270_v61 = vld [vmem:[#allocation11 + $0x168] sm:$0xf0]  ;;  %v1177_v62 = vor.u32 %v1447_v57, %v1174_v59  ;;  %v1429_v2 = vld [vmem:[#allocation11 + $0x14] sm:$0xf] }
  0x5b   :  { %v1273_v43 = vor.u32 %v1471_v60, %v1270_v61  ;;  %v1102_v3 = vld [vmem:[#allocation11 + $0x18] sm:$0xf0]  ;;  %v1469_v7 = vld [vmem:[#allocation11 + $0x154] sm:$0xf]  ;;  %v1094_v15 = vld [vmem:[#allocation11 + $0x8] sm:$0xf0] }
  0x5c   :  { %752 = vmatpush.bf16.msra.mxu2 %v1261_v40  ;;  %v1476_v40 = vld [vmem:[#allocation11 + $0x184] sm:$0xf0]  ;;  %v1105_v4 = vor.u32 %v1429_v2, %v1102_v3  ;;  %v1166_v6 = vld [vmem:[#allocation11 + $0x98] sm:$0xf0]  ;;  %v1443_v16 = vld [vmem:[#allocation11 + $0x84] sm:$0xf] }
  0x5d   :  { %765 = vmatpush.bf16.msra.mxu3 %v1325_v52  ;;  %776 = vmatpush.bf16.msrb.mxu0 %v1153_v63  ;;  %v1285_v44 = vor.u32 %v1476_v40, %v1284_v38  ;;  %v1342_v52 = vld [vmem:[#allocation11 + $0x1f8] sm:$0xf0]  ;;  %v1487_v63 = vld [vmem:[#allocation11 + $0x1e4] sm:$0xf]  ;;  %v1158_v18 = vld [vmem:[#allocation11 + $0x88] sm:$0xf0] }
  0x5e   :  { %789 = vmatpush.bf16.msrb.mxu1 %v1217_v1  ;;  %v1345_v54 = vor.u32 %v1489_v51, %v1342_v52  ;;  %v1467_v19 = vld [vmem:[#allocation11 + $0x144] sm:$0xf]  ;;  %v1254_v20 = vld [vmem:[#allocation11 + $0x148] sm:$0xf0]  ;;  %v1465_v26 = vld [vmem:[#allocation11 + $0x134] sm:$0xf] }
  0x5f   :  { %v1257_v22 = vor.u32 %v1467_v19, %v1254_v20  ;;  %v1318_v24 = vld [vmem:[#allocation11 + $0x1c8] sm:$0xf0]  ;;  %v1481_v28 = vld [vmem:[#allocation11 + $0x1b4] sm:$0xf]  ;;  %v1310_v30 = vld [vmem:[#allocation11 + $0x1b8] sm:$0xf0] }
  0x60   :  { %753 = vmatpush.bf16.msra.mxu2 %v1253_v56  ;;  %v1110_v56 = vld [vmem:[#allocation11 + $0x28] sm:$0xf0]  ;;  %v1463_v33 = vld [vmem:[#allocation11 + $0x124] sm:$0xf]  ;;  %v1461_v41 = vld [vmem:[#allocation11 + $0x114] sm:$0xf] }
  0x61   :  { %766 = vmatpush.bf16.msra.mxu3 %v1317_v0  ;;  %777 = vmatpush.bf16.msrb.mxu0 %v1145_v9  ;;  %v1113_v58 = vor.u32 %v1431_v55, %v1110_v56  ;;  %v1334_v0 = vld [vmem:[#allocation11 + $0x1e8] sm:$0xf0]  ;;  %v1262_v9 = vld [vmem:[#allocation11 + $0x158] sm:$0xf0]  ;;  %v1459_v52 = vld [vmem:[#allocation11 + $0x104] sm:$0xf] }
  0x62   :  { %790 = vmatpush.bf16.msrb.mxu1 %v1209_v11  ;;  %v1337_v1 = vor.u32 %v1487_v63, %v1334_v0  ;;  %v1326_v11 = vld [vmem:[#allocation11 + $0x1d8] sm:$0xf0]  ;;  %v1265_v12 = vor.u32 %v1469_v7, %v1262_v9  ;;  %v1238_v34 = vld [vmem:[#allocation11 + $0x128] sm:$0xf0]  ;;  %v1475_v55 = vld [vmem:[#allocation11 + $0x184] sm:$0xf] }
  0x63   :  { %v1302_v36 = vld [vmem:[#allocation11 + $0x1a8] sm:$0xf0]  ;;  %v1241_v38 = vor.u32 %v1463_v33, %v1238_v34  ;;  %v1230_v42 = vld [vmem:[#allocation11 + $0x118] sm:$0xf0]  ;;  %v398_v34 = vld [vmem:[#allocation13] sm:$0x3] }
  0x64   :  { %754 = vmatpush.bf16.msra.mxu2 %v1245_v5  ;;  %v1445_v5 = vld [vmem:[#allocation11 + $0x94] sm:$0xf]  ;;  %v1286_v56 = vld [vmem:[#allocation11 + $0x188] sm:$0xf0]  ;;  %v1494_v19 = vld [vmem:[#allocation14 + $0x18] sm:$0xff]  ;;  %s1711_s13 = smov [#allocation16]  }
  0x65   :  { %767 = vmatpush.bf16.msra.mxu3 %v1309_v10  ;;  %778 = vmatpush.bf16.msrb.mxu0 %v1137_v21  ;;  %v1169_v8 = vor.u32 %v1445_v5, %v1166_v6  ;;  %v1485_v10 = vld [vmem:[#allocation11 + $0x1d4] sm:$0xf]  ;;  %v1161_v21 = vor.u32 %v1443_v16, %v1158_v18  ;;  %v1289_v61 = vor.u32 %v1475_v55, %v1286_v56  ;;  %v1495_v18 = vld [vmem:[#allocation14 + $0x20] sm:$0xff]  ;;  %v1506_v20 = vld [vmem:[#allocation14 + $0x78] sm:$0xff]  ;;  %s1000_s14 = sshll.u32 %s1711_s13, 4  ;;  %s1002_s16 = sshll.u32 %s1817_s8, 4  ;;  %s1001_s14 = int_to_ptr.vmem [resolvable:$true] %s1000_s14  ;;  %s1003_s16 = int_to_ptr.hbm [resolvable:$true] %s1002_s16 }
  0x66   :  { %791 = vmatpush.bf16.msrb.mxu1 %v1201_v23  ;;  %v1329_v13 = vor.u32 %v1485_v10, %v1326_v11  ;;  %v1483_v23 = vld [vmem:[#allocation11 + $0x1c4] sm:$0xf]  ;;  %v1497_v16 = vld [vmem:[#allocation14 + $0x30] sm:$0xff]  ;;  %v1500_v33 = vld [vmem:[#allocation14 + $0x48] sm:$0xff] }
  0x67   :  { %v1321_v25 = vor.u32 %v1483_v23, %v1318_v24  ;;  %v1492_v23 = vld [vmem:[#allocation14 + $0x8] sm:$0xff] }
  0x68   :  { %755 = vmatpush.bf16.msra.mxu2 %v1237_v14  ;;  %v1427_v14 = vld [vmem:[#allocation11 + $0x4] sm:$0xf]  ;;  %v1504_v24 = vld [vmem:[#allocation14 + $0x68] sm:$0xff] }
  0x69   :  { %768 = vmatpush.bf16.msra.mxu3 %v1301_v17  ;;  %779 = vmatpush.bf16.msrb.mxu0 %v1129_v32  ;;  %v1097_v17 = vor.u32 %v1427_v14, %v1094_v15  ;;  %v1313_v32 = vor.u32 %v1481_v28, %v1310_v30  ;;  %v1498_v15 = vld [vmem:[#allocation14 + $0x38] sm:$0xff]  ;;  %v1501_v30 = vld [vmem:[#allocation14 + $0x50] sm:$0xff] }
  0x6a   :  { %792 = vmatpush.bf16.msrb.mxu1 %v1193_v35  ;;  %v1479_v35 = vld [vmem:[#allocation11 + $0x1a4] sm:$0xf] }
  0x6b   :  { %v1305_v40 = vor.u32 %v1479_v35, %v1302_v36  ;;  %v400_v35 = vperm.slane %v398_v34, 0  ;;  %v1499_v36 = vld [vmem:[#allocation14 + $0x40] sm:$0xff] }
  0x6c   :  { %756 = vmatpush.bf16.msra.mxu2 %v1229_v27  ;;  %v1246_v27 = vld [vmem:[#allocation11 + $0x138] sm:$0xf0] }
  0x6d   :  { %769 = vmatpush.bf16.msra.mxu3 %v1293_v31  ;;  %780 = vmatpush.bf16.msrb.mxu0 %v1121_v45  ;;  %v1249_v29 = vor.u32 %v1465_v26, %v1246_v27  ;;  %v308_v31 = vld [vmem:[#allocation10] sm:$0xf]  ;;  %v1503_v26 = vld [vmem:[#allocation14 + $0x60] sm:$0xff] }
  0x6e   :  { %793 = vmatpush.bf16.msrb.mxu1 %v1185_v49  ;;  %v310_v37 = vperm.slane %v308_v31, 0  ;;  %v1294_v45 = vld [vmem:[#allocation11 + $0x198] sm:$0xf0]  ;;  %v1233_v49 = vor.u32 %v1461_v41, %v1230_v42  ;;  %v313_v2 = vperm.slane %v308_v31, 3 }
  0x70   :  { %757 = vmatpush.bf16.msra.mxu2 %v1221_v39  ;;  %v311_v39 = vperm.slane %v308_v31, 1 }
  0x71   :  { %770 = vmatpush.bf16.msra.mxu3 %v1285_v44  ;;  %781 = vmatpush.bf16.msrb.mxu0 %v1113_v58  ;;  %v1477_v44 = vld [vmem:[#allocation11 + $0x194] sm:$0xf] }
  0x72   :  { %794 = vmatpush.bf16.msrb.mxu1 %v1177_v62  ;;  %v1297_v51 = vor.u32 %v1477_v44, %v1294_v45 }
  0x74   :  { %802 = vmatpush.bf16.msrb.mxu2 %v1281_v53  ;;  %v1222_v53 = vld [vmem:[#allocation11 + $0x108] sm:$0xf0] }
  0x75   :  { %815 = vmatpush.bf16.msrb.mxu3 %v1345_v54  ;;  %782 = vmatpush.bf16.msrb.mxu0 %v1105_v4  ;;  %v1225_v59 = vor.u32 %v1459_v52, %v1222_v53 }
  0x76   :  { %795 = vmatpush.bf16.msrb.mxu1 %v1169_v8 }
  0x78   :  { %803 = vmatpush.bf16.msrb.mxu2 %v1273_v43 }
  0x79   :  { %816 = vmatpush.bf16.msrb.mxu3 %v1337_v1  ;;  %783 = vmatpush.bf16.msrb.mxu0 %v1097_v17  ;;  %v312_v1 = vperm.slane %v308_v31, 2  ;;  %v1496_v17 = vld [vmem:[#allocation14 + $0x28] sm:$0xff] }
  0x7a   :  { %796 = vmatpush.bf16.msrb.mxu1 %v1161_v21  ;;  %v1493_v21 = vld [vmem:[#allocation14 + $0x10] sm:$0xff] }
  0x7c   :  { %804 = vmatpush.bf16.msrb.mxu2 %v1265_v12 }
  0x7d   :  { %817 = vmatpush.bf16.msrb.mxu3 %v1329_v13 }
  0x80   :  { %805 = vmatpush.bf16.msrb.mxu2 %v1257_v22  ;;  %v1505_v22 = vld [vmem:[#allocation14 + $0x70] sm:$0xff] }
  0x81   :  { %818 = vmatpush.bf16.msrb.mxu3 %v1321_v25  ;;  %v1491_v25 = vld [vmem:[#allocation14] sm:$0xff] }
  0x84   :  { %806 = vmatpush.bf16.msrb.mxu2 %v1249_v29  ;;  %v1502_v29 = vld [vmem:[#allocation14 + $0x58] sm:$0xff] }
  0x85   :  { %819 = vmatpush.bf16.msrb.mxu3 %v1313_v32 }
  0x88   :  { %807 = vmatpush.bf16.msrb.mxu2 %v1241_v38 }
  0x89   :  { %820 = vmatpush.bf16.msrb.mxu3 %v1305_v40 }
  0x8c   :  { %808 = vmatpush.bf16.msrb.mxu2 %v1233_v49  ;;  %v401_v49 = vperm.slane %v398_v34, 1 }
  0x8d   :  { %821 = vmatpush.bf16.msrb.mxu3 %v1297_v51 }
  0x90   :  { %809 = vmatpush.bf16.msrb.mxu2 %v1225_v59 }
  0x91   :  { %822 = vmatpush.bf16.msrb.mxu3 %v1289_v61 }
  0xc6   :  { %v250_v46 = vpop.f32.mrf.mxu2 }
  0xc7   :  { %v318_v47 = vadd.f32 %v310_v37, %v250_v46  ;;  %v263_v48 = vpop.f32.mrf.mxu3 }
  0xc8   :  { %v319_v50 = vadd.f32 %v311_v39, %v263_v48 }
  0xc9   :  { %v322_v54 = vmul.f32 0.2, %v318_v47 }
  0xca   :  { %v323_v57 = vmul.f32 0.2, %v319_v50 }
  0xcb   :  { %v326_v58 = vmax.f32 %v318_v47, %v322_v54 }
  0xcc   :  { %v327_v60 = vmax.f32 %v319_v50, %v323_v57 }
  0xcd   :  { %v330_v62 = vpack.c.bf16 %v326_v58, %v326_v58 }
  0xce   :  { %v252_v43 = vpop.f32.mrf.mxu2  ;;  %v331_v63 = vpack.c.bf16 %v327_v60, %v327_v60 }
  0xcf   :  { %v265_v0 = vpop.f32.mrf.mxu3  ;;  %732 = vmatmul.bf16.vlgmr.msra.gmra.mxu0 %v330_v62 }
  0xd0   :  { %745 = vmatmul.bf16.vlgmr.msra.gmra.mxu1 %v331_v63  ;;  %966 = vmatpush.bf16.msra.mxu0 %v1498_v15 }
  0xd1   :  { %979 = vmatpush.bf16.msra.mxu1 %v1506_v20 }
  0xd4   :  { %967 = vmatpush.bf16.msra.mxu0 %v1497_v16 }
  0xd5   :  { %980 = vmatpush.bf16.msra.mxu1 %v1505_v22 }
  0xd6   :  { %v276_v3 = vpop.f32.mrf.mxu2 }
  0xd7   :  { %v320_v4 = vadd.f32 %v312_v1, %v276_v3  ;;  %v289_v5 = vpop.f32.mrf.mxu3 }
  0xd8   :  { %v321_v6 = vadd.f32 %v313_v2, %v289_v5  ;;  %968 = vmatpush.bf16.msra.mxu0 %v1496_v17  ;;  %v1520_v2 = vld [vmem:[%s1816_s7] ss:$0 sm:$0xff] }
  0xd9   :  { %v324_v7 = vmul.f32 0.2, %v320_v4  ;;  %981 = vmatpush.bf16.msra.mxu1 %v1504_v24 }
  0xda   :  { %v325_v8 = vmul.f32 0.2, %v321_v6 }
  0xdb   :  { %v328_v9 = vmax.f32 %v320_v4, %v324_v7 }
  0xdc   :  { %v329_v10 = vmax.f32 %v321_v6, %v325_v8  ;;  %969 = vmatpush.bf16.msra.mxu0 %v1495_v18 }
  0xdd   :  { %v332_v11 = vpack.c.bf16 %v328_v9, %v328_v9  ;;  %982 = vmatpush.bf16.msra.mxu1 %v1503_v26 }
  0xde   :  { %v333_v12 = vpack.c.bf16 %v329_v10, %v329_v10  ;;  %v278_v13 = vpop.f32.mrf.mxu2 }
  0xdf   :  { %v291_v14 = vpop.f32.mrf.mxu3  ;;  %758 = vmatmul.bf16.vlgmr.msra.gmra.mxu2 %v332_v11  ;;  %784 = vmatmul.bf16.vlgmr.msrb.gmra.mxu0 %v330_v62 }
  0xe0   :  { %771 = vmatmul.bf16.vlgmr.msra.gmra.mxu3 %v333_v12  ;;  %797 = vmatmul.bf16.vlgmr.msrb.gmra.mxu1 %v331_v63 }
  0xe1   :  { %970 = vmatpush.bf16.msra.mxu0 %v1494_v19  ;;  %983 = vmatpush.bf16.msra.mxu1 %v1502_v29 }
  0xe5   :  { %971 = vmatpush.bf16.msra.mxu0 %v1493_v21  ;;  %984 = vmatpush.bf16.msra.mxu1 %v1501_v30 }
  0xe9   :  { %972 = vmatpush.bf16.msra.mxu0 %v1492_v23  ;;  %985 = vmatpush.bf16.msra.mxu1 %v1500_v33 }
  0xed   :  { %973 = vmatpush.bf16.msra.mxu0 %v1491_v25  ;;  %986 = vmatpush.bf16.msra.mxu1 %v1499_v36 }
  0xef   :  { %810 = vmatmul.bf16.vlgmr.msrb.gmra.mxu2 %v332_v11 }
  0xf0   :  { %823 = vmatmul.bf16.vlgmr.msrb.gmra.mxu3 %v333_v12 }
 0x14c   :  { %v733_v27 = vpop.f32.mrf.mxu0 }
 0x14d   :  { %v746_v28 = vpop.f32.mrf.mxu1  ;;  %v734_v38 = vadd.f32 %v733_v27, %v400_v35 }
 0x14f   :  { %v747_v40 = vadd.f32 %v746_v28, %v734_v38 }
 0x154   :  { %v735_v31 = vpop.f32.mrf.mxu0 }
 0x155   :  { %v748_v32 = vpop.f32.mrf.mxu1 }
 0x15c   :  { %v785_v37 = vpop.f32.mrf.mxu0 }
 0x15d   :  { %v798_v39 = vpop.f32.mrf.mxu1  ;;  %v786_v54 = vadd.f32 %v785_v37, %v401_v49 }
 0x15f   :  { %v799_v55 = vadd.f32 %v798_v39, %v786_v54 }
 0x162   :  { %v759_v41 = vpop.f32.mrf.mxu2 }
 0x163   :  { %v760_v42 = vadd.f32 %v759_v41, %v747_v40  ;;  %v772_v44 = vpop.f32.mrf.mxu3 }
 0x164   :  { %v787_v45 = vpop.f32.mrf.mxu0 }
 0x165   :  { %v773_v46 = vadd.f32 %v772_v44, %v760_v42  ;;  %v800_v47 = vpop.f32.mrf.mxu1 }
 0x167   :  { %v828_v48 = vmul.f32 0.2, %v773_v46 }
 0x169   :  { %v830_v50 = vmax.f32 %v773_v46, %v828_v48 }
 0x16a   :  { %v761_v51 = vpop.f32.mrf.mxu2 }
 0x16b   :  { %v832_v52 = vpack.c.bf16 %v830_v50, %v830_v50  ;;  %v774_v53 = vpop.f32.mrf.mxu3 }
 0x16d   :  { %974 = vmatmul.bf16.vlgmr.msra.gmra.mxu0 %v832_v52 }
 0x172   :  { %v811_v56 = vpop.f32.mrf.mxu2 }
 0x173   :  { %v812_v57 = vadd.f32 %v811_v56, %v799_v55  ;;  %v824_v58 = vpop.f32.mrf.mxu3 }
 0x175   :  { %v825_v59 = vadd.f32 %v824_v58, %v812_v57 }
 0x177   :  { %v829_v60 = vmul.f32 0.2, %v825_v59 }
 0x179   :  { %v831_v61 = vmax.f32 %v825_v59, %v829_v60 }
 0x17a   :  { %v813_v62 = vpop.f32.mrf.mxu2 }
 0x17b   :  { %v833_v43 = vpack.c.bf16 %v831_v61, %v831_v61  ;;  %v826_v63 = vpop.f32.mrf.mxu3 }
 0x17d   :  { %987 = vmatmul.bf16.vlgmr.msra.gmra.mxu1 %v833_v43 }
 0x1ea   :  { %v975_v0 = vpop.f32.mrf.mxu0 }
 0x1eb   :  { %v976_v3 = vadd.f32 %v1520_v2, %v975_v0 }
 0x1f2   :  { %v977_v1 = vpop.f32.mrf.mxu0 }
 0x1fa   :  { %v988_v4 = vpop.f32.mrf.mxu1 }
 0x1fb   :  { %v989_v5 = vadd.f32 %v988_v4, %v976_v3 }
 0x1fd   :  { %v992_v6 = vmul.f32 0.2, %v989_v5 }
 0x1ff   :  { %v993_v7 = vmax.f32 %v989_v5, %v992_v6 }
 0x201   :  { %994 = vst [vmem:[#allocation16] sm:$0xff] %v993_v7 }
 0x202   :  { %v990_v8 = vpop.f32.mrf.mxu1  ;;  %1005 = dma.vmem_to_hbm [thread:$0]  %s1001_s14, 128, %s1003_s16, [#allocation7]  }
 0x203   :  { %1697 = dma.done.wait [#allocation7], 128  }
 0x204   :  { %1698 = vsyncadd [#allocation7], 4294967168 }
 0x205   :  { %1010 = vsyncpa [#allocation6], 1 }
 0x206   :  { %1011 = vsyncpa [#allocation9], 1 }
 0x207   :  { %1012 = vsyncpa [#allocation12], 1 }
 0x208   :  { %1013 = vsyncpa [#allocation15], 1 }
 0x209   :  { %1014 = vsyncpa [#allocation7], 1 }

</bundles_post_ra>
